<compile_context>
chip_gen: v6e
topology: v6e:2x2x1
jax: 0.10.0
libtpu: 0.0.40
codegen_flags: <defaults>
</compile_context>

<pallas_src>
import jax
import jax.numpy as jnp
from jax.experimental import pallas as pl
from jax.experimental.pallas import tpu as pltpu


def _round_up(x, m):
    return ((x + m - 1) // m) * m


def encoder_kernel(x_ref, w1_ref, b1_ref, w2_ref, b2_ref, o_ref):
    # Fused 2-layer MLP, all tiles resident in VMEM:
    #   f32 x -> bf16 cast -> MXU (f32 acc) -> f32 bias+ReLU -> MXU -> f32 bias
    x = x_ref[...].astype(jnp.bfloat16)                          # (bb, d_in)
    h = jnp.dot(x, w1_ref[...], preferred_element_type=jnp.float32)
    h = jnp.maximum(h + b1_ref[...], 0.0)                        # f32 bias + ReLU
    y = jnp.dot(h.astype(jnp.bfloat16), w2_ref[...],
                preferred_element_type=jnp.float32)
    o_ref[...] = (y + b2_ref[...]).astype(o_ref.dtype)           # f32 bias


def encoder_forward(x, w1, b1, w2, b2, *, block_b=1024, out_dtype=None):
    """x: (B, input_dim). Returns (B, latent_dim).

    w1: (input_dim, 256), b1: (256,), w2: (256, latent_dim), b2: (latent_dim,)
    (weights stored as (in, out) so y = x @ W + b matches PyTorch's
     y = x @ W.T + b with W of shape (out, in)).
    """
    B, d_in = x.shape
    hidden = w1.shape[1]
    d_lat = w2.shape[1]
    assert w1.shape == (d_in, hidden)
    assert b1.shape == (hidden,)
    assert w2.shape == (hidden, d_lat)
    assert b2.shape == (d_lat,)
    out_dtype = x.dtype if out_dtype is None else out_dtype

    # Batch tile: multiple of 8 (sublane), capped at block_b, and capped at
    # ceil(B/2) so the grid has >=2 steps whenever there is enough work
    # (lets the "parallel" batch axis shard across both v7x TensorCores).
    bb = min(block_b, _round_up(B, 8))
    half = _round_up((B + 1) // 2, 8)
    if 8 <= half < bb:
        bb = half
    bb = max(8, (bb // 8) * 8)
    grid_b = pl.cdiv(B, bb)
    # NOTE: when B % bb != 0 the final block's out-of-range rows flow through
    # bias/ReLU/matmul with garbage values, but each output row depends only on
    # its own input row and Pallas masks the out-of-range writeback -- this is
    # intentional and correct; do NOT "fix" it by padding B.

    # One-time cast of the (small) weights to bf16; biases stay f32.
    w1_c = w1.astype(jnp.bfloat16)
    w2_c = w2.astype(jnp.bfloat16)
    b1_c = b1.astype(jnp.float32).reshape(1, hidden)
    b2_c = b2.astype(jnp.float32).reshape(1, d_lat)

    # Constant index maps -> never re-fetched -> single buffer saves VMEM
    # (matters on v7x's 64 MiB physical / 32 MiB scoped VMEM at large d_in).
    resident = dict(pipeline_mode=pl.Buffered(1))

    cost = pl.CostEstimate(
        flops=2 * B * (d_in * hidden + hidden * d_lat),
        transcendentals=0,
        bytes_accessed=(x.size * x.dtype.itemsize
                        + w1_c.size * 2 + w2_c.size * 2
                        + b1_c.size * 4 + b2_c.size * 4
                        + B * d_lat * jnp.dtype(out_dtype).itemsize),
    )

    out = pl.pallas_call(
        encoder_kernel,
        out_shape=jax.ShapeDtypeStruct((B, d_lat), out_dtype),
        grid_spec=pl.GridSpec(
            grid=(grid_b,),
            in_specs=[
                # x tile: unpadded f32, full-extent feature dim (contiguous DMA).
                pl.BlockSpec((bb, d_in), lambda i: (i, 0)),
                pl.BlockSpec((d_in, hidden), lambda i: (0, 0), **resident),   # w1
                pl.BlockSpec((1, hidden), lambda i: (0, 0), **resident),      # b1
                pl.BlockSpec((hidden, d_lat), lambda i: (0, 0), **resident),  # w2
                pl.BlockSpec((1, d_lat), lambda i: (0, 0), **resident),       # b2
            ],
            # True-shape output: no 128 padding, no post-slice.
            out_specs=pl.BlockSpec((bb, d_lat), lambda i: (i, 0)),
        ),
        compiler_params=pltpu.CompilerParams(
            dimension_semantics=("parallel",),
            vmem_limit_bytes=64 * 1024 * 1024,
        ),
        cost_estimate=cost,
    )(x, w1_c, b1_c, w2_c, b2_c)

    return out


def init_params(key, input_dim, latent_dim, hidden=256):
    # Deterministic init mimicking nn.Linear's uniform(-1/sqrt(fan_in), 1/sqrt(fan_in)).
    k1, k2, k3, k4 = jax.random.split(key, 4)
    lim1 = 1.0 / jnp.sqrt(input_dim)
    lim2 = 1.0 / jnp.sqrt(hidden)
    w1 = jax.random.uniform(k1, (input_dim, hidden), jnp.float32, -lim1, lim1)
    b1 = jax.random.uniform(k2, (hidden,), jnp.float32, -lim1, lim1)
    w2 = jax.random.uniform(k3, (hidden, latent_dim), jnp.float32, -lim2, lim2)
    b2 = jax.random.uniform(k4, (latent_dim,), jnp.float32, -lim2, lim2)
    return w1, b1, w2, b2


if __name__ == "__main__":
    key = jax.random.PRNGKey(0)
    kx, kp, kx2 = jax.random.split(key, 3)

    B, input_dim, latent_dim = 8, 32, 16
    x = jax.random.normal(kx, (B, input_dim), jnp.float32)
    w1, b1, w2, b2 = init_params(kp, input_dim, latent_dim)

    out = encoder_forward(x, w1, b1, w2, b2)
    out = jax.block_until_ready(out)

    # Reference check in plain JAX (f32). bf16 matmul operands -> loose tol.
    ref = jnp.maximum(x @ w1 + b1, 0.0) @ w2 + b2
    assert out.shape == (B, latent_dim)
    assert out.dtype == jnp.float32
    assert jnp.allclose(out, ref, atol=3e-2, rtol=3e-2), "mismatch vs reference"

    # Second check: B not a multiple of the batch tile -> exercises the
    # ceil-div grid, the multi-step "parallel" batch axis and the masked
    # partial final block.
    B2 = 20
    x2 = jax.random.normal(kx2, (B2, input_dim), jnp.float32)
    out2 = jax.block_until_ready(
        encoder_forward(x2, w1, b1, w2, b2, block_b=16))
    ref2 = jnp.maximum(x2 @ w1 + b1, 0.0) @ w2 + b2
    assert out2.shape == (B2, latent_dim)
    assert jnp.allclose(out2, ref2, atol=3e-2, rtol=3e-2), \
        "mismatch vs reference (partial final block)"

    print("KERNEL_OK")
</pallas_src>

<mosaic_0001>
module attributes {stable_mosaic.version = 11 : i64} {
  func.func @encoder_kernel(%arg0: i32, %arg1: memref<8x32xf32, #tpu.memory_space<vmem>>, %arg2: memref<32x256xbf16, #tpu.memory_space<vmem>>, %arg3: memref<1x256xf32, #tpu.memory_space<vmem>>, %arg4: memref<256x16xbf16, #tpu.memory_space<vmem>>, %arg5: memref<1x16xf32, #tpu.memory_space<vmem>>, %arg6: memref<8x16xf32, #tpu.memory_space<vmem>>) attributes {dimension_semantics = [#tpu.dimension_semantics<parallel>], iteration_bounds = array<i64: 1>, scalar_prefetch = 0 : i64, scratch_operands = 0 : i64, tpu.core_type = #tpu.core_type<tc>, window_params = [{transform_indices = @transform_0, window_bounds = array<i64: 8, 32>}, {pipeline_mode = #tpu.pipeline_mode<synchronous>, transform_indices = @transform_1, window_bounds = array<i64: 32, 256>}, {pipeline_mode = #tpu.pipeline_mode<synchronous>, transform_indices = @transform_2, window_bounds = array<i64: 1, 256>}, {pipeline_mode = #tpu.pipeline_mode<synchronous>, transform_indices = @transform_3, window_bounds = array<i64: 256, 16>}, {pipeline_mode = #tpu.pipeline_mode<synchronous>, transform_indices = @transform_4, window_bounds = array<i64: 1, 16>}, {transform_indices = @transform_5, window_bounds = array<i64: 8, 16>}]} {
    %c0 = arith.constant 0 : index
    %c0_0 = arith.constant 0 : index
    %0 = vector.load %arg1[%c0, %c0_0] : memref<8x32xf32, #tpu.memory_space<vmem>>, vector<8x32xf32>
    %1 = arith.truncf %0 : vector<8x32xf32> to vector<8x32xbf16>
    %c0_1 = arith.constant 0 : index
    %c0_2 = arith.constant 0 : index
    %2 = vector.load %arg2[%c0_1, %c0_2] : memref<32x256xbf16, #tpu.memory_space<vmem>>, vector<32x256xbf16>
    %cst = arith.constant dense<0.000000e+00> : vector<8x256xf32>
    %3 = tpu.matmul %1, %2, %cst {dimension_numbers = #tpu.dot_dimension_numbers<[1], [0], [0], [1], [0, 0, 1, 1], [], []>} : vector<8x32xbf16>, vector<32x256xbf16>, vector<8x256xf32> -> vector<8x256xf32>
    %c0_3 = arith.constant 0 : index
    %c0_4 = arith.constant 0 : index
    %4 = vector.load %arg3[%c0_3, %c0_4] : memref<1x256xf32, #tpu.memory_space<vmem>>, vector<1x256xf32>
    %5 = vector.broadcast %4 : vector<1x256xf32> to vector<8x256xf32>
    %6 = arith.addf %3, %5 : vector<8x256xf32>
    %cst_5 = arith.constant 0.000000e+00 : f32
    %7 = vector.broadcast %cst_5 : f32 to vector<8x256xf32>
    %8 = arith.maximumf %6, %7 : vector<8x256xf32>
    %9 = arith.truncf %8 : vector<8x256xf32> to vector<8x256xbf16>
    %c0_6 = arith.constant 0 : index
    %c0_7 = arith.constant 0 : index
    %10 = vector.load %arg4[%c0_6, %c0_7] : memref<256x16xbf16, #tpu.memory_space<vmem>>, vector<256x16xbf16>
    %cst_8 = arith.constant dense<0.000000e+00> : vector<8x16xf32>
    %11 = tpu.matmul %9, %10, %cst_8 {dimension_numbers = #tpu.dot_dimension_numbers<[1], [0], [0], [1], [0, 0, 1, 1], [], []>} : vector<8x256xbf16>, vector<256x16xbf16>, vector<8x16xf32> -> vector<8x16xf32>
    %c0_9 = arith.constant 0 : index
    %c0_10 = arith.constant 0 : index
    %12 = vector.load %arg5[%c0_9, %c0_10] : memref<1x16xf32, #tpu.memory_space<vmem>>, vector<1x16xf32>
    %13 = vector.broadcast %12 : vector<1x16xf32> to vector<8x16xf32>
    %14 = arith.addf %11, %13 : vector<8x16xf32>
    %c0_11 = arith.constant 0 : index
    %c0_12 = arith.constant 0 : index
    %15 = vector.load %arg6[%c0_11, %c0_12] : memref<8x16xf32, #tpu.memory_space<vmem>>, vector<8x16xf32>
    tpu.vector_store %arg6[%c0_11, %c0_12], %14 {strides = array<i32>} : memref<8x16xf32, #tpu.memory_space<vmem>>, vector<8x16xf32>,
    return
  }
  func.func @transform_0(%arg0: i32) -> (i32, i32) {
    %c0_i32 = arith.constant 0 : i32
    %c0_i32_0 = arith.constant 0 : i32
    return %arg0, %c0_i32 : i32, i32
  }
  func.func @transform_1(%arg0: i32) -> (i32, i32) {
    %c0_i32 = arith.constant 0 : i32
    %c0_i32_0 = arith.constant 0 : i32
    %c0_i32_1 = arith.constant 0 : i32
    return %c0_i32, %c0_i32_0 : i32, i32
  }
  func.func @transform_2(%arg0: i32) -> (i32, i32) {
    %c0_i32 = arith.constant 0 : i32
    %c0_i32_0 = arith.constant 0 : i32
    %c0_i32_1 = arith.constant 0 : i32
    return %c0_i32, %c0_i32_0 : i32, i32
  }
  func.func @transform_3(%arg0: i32) -> (i32, i32) {
    %c0_i32 = arith.constant 0 : i32
    %c0_i32_0 = arith.constant 0 : i32
    %c0_i32_1 = arith.constant 0 : i32
    return %c0_i32, %c0_i32_0 : i32, i32
  }
  func.func @transform_4(%arg0: i32) -> (i32, i32) {
    %c0_i32 = arith.constant 0 : i32
    %c0_i32_0 = arith.constant 0 : i32
    %c0_i32_1 = arith.constant 0 : i32
    return %c0_i32, %c0_i32_0 : i32, i32
  }
  func.func @transform_5(%arg0: i32) -> (i32, i32) {
    %c0_i32 = arith.constant 0 : i32
    %c0_i32_0 = arith.constant 0 : i32
    return %arg0, %c0_i32 : i32, i32
  }
}

</mosaic_0001>

<bundles_post_ra>
// kernel: tpu_custom_call.1
= control target key start
LH: loop header
LB: loop body
LE: loop exit
PB: predicated region body
PF: predicated region fallthrough
CT: control target
= control target key end

     0   :  { %v390_v2 = vmov 0   ;;  %vm60_vm0 = vcmask 261120   ;;  %s494_s0 = inlined_call_operand.vmem [shape: f32[8,32], index: 0, kind: input, shape index: {}]   ;;  %s495_s1 = inlined_call_operand.vmem [shape: bf16[32,256], index: 1, kind: input, shape index: {}]   ;;  %s496_s2 = inlined_call_operand.vmem [shape: f32[1,256], index: 2, kind: input, shape index: {}]   ;;  %s497_s3 = inlined_call_operand.vmem [shape: bf16[256,16], index: 3, kind: input, shape index: {}]   ;;  %s498_s4 = inlined_call_operand.vmem [shape: f32[1,16], index: 4, kind: input, shape index: {}]   ;;  %s499_s5 = inlined_call_operand.hbm [shape: f32[8,16], index: 5, kind: output, shape index: {}]  }
   0x1   :  { %v346_v0 = vld [vmem:[%s495_s1 + $0x14] ss:$8 sps:$4 sm:$0xff]   ;;  %v348_v1 = vld [vmem:[%s495_s1 + $0x10] ss:$8 sps:$4 sm:$0xff]   ;;  %96 = vmatprep.mubr.bf16.mxu0 %v390_v2  ;;  %v349_v3 = vld [vmem:[%s495_s1 + $0x4] ss:$8 sps:$4 sm:$0xff]  }
   0x2   :  { %76 = vmatprep.subr.bf16.mxu0 %v346_v0  ;;  %v351_v4 = vld [vmem:[%s495_s1] ss:$8 sps:$4 sm:$0xff]   ;;  %v352_v6 = vld [vmem:[%s497_s3 + $0x78] sm:$0xff]   ;;  %v354_v8 = vld [vmem:[%s497_s3 + $0x70] sm:$0xff]  }
   0x3   :  { %v22_v5 = vld [vmem:[%s494_s0] sm:$0xff]  ;;  %77 = vmatpush1.bf16.msra.mxu0 %v348_v1  ;;  %v353_v7 = vld [vmem:[%s497_s3 + $0x38] sm:$0xff]   ;;  %322 = vmatprep.subr.bf16.mxu1 %v352_v6  ;;  %v355_v10 = vld [vmem:[%s497_s3 + $0x30] sm:$0xff]  }
   0x4   :  { %78 = vmatprep.subr.bf16.mxu0 %v349_v3  ;;  %v23_v9 = vpack.c.bf16 %v22_v5, %v22_v5  ;;  %323 = vmatpush3.bf16.msra.mxu1 %v353_v7  ;;  %v356_v11 = vld [vmem:[%s497_s3 + $0x68] sm:$0xff]   ;;  %v358_v13 = vld [vmem:[%s497_s3 + $0x60] sm:$0xff]   ;;  %v360_v15 = vld [vmem:[%s497_s3 + $0x58] sm:$0xff]  }
   0x5   :  { %324 = vmatprep.subr.bf16.mxu1 %v354_v8  ;;  %v357_v12 = vld [vmem:[%s497_s3 + $0x28] sm:$0xff]   ;;  %v359_v14 = vld [vmem:[%s497_s3 + $0x20] sm:$0xff]   ;;  %v361_v16 = vld [vmem:[%s497_s3 + $0x18] sm:$0xff]  }
   0x7   :  { %79 = vmatpush1.bf16.msra.mxu0 %v351_v4 }
   0x8   :  { %325 = vmatpush3.bf16.msra.mxu1 %v355_v10 }
   0x9   :  { %326 = vmatprep.subr.bf16.mxu1 %v356_v11 }
   0xa   :  { %304 = vmatmul.mubr.msk.bf16.vlgmr.msra.gmra.mxu0 %vm60_vm0, %v23_v9 }
   0xc   :  { %327 = vmatpush3.bf16.msra.mxu1 %v357_v12 }
   0xd   :  { %328 = vmatprep.subr.bf16.mxu1 %v358_v13 }
  0x10   :  { %329 = vmatpush3.bf16.msra.mxu1 %v359_v14 }
  0x11   :  { %10 = vsyncpa [#allocation3], 0  ;;  %330 = vmatprep.subr.bf16.mxu1 %v360_v15  ;;  %v362_v17 = vld [vmem:[%s497_s3 + $0x50] sm:$0xff]   ;;  %v364_v19 = vld [vmem:[%s497_s3 + $0x48] sm:$0xff]   ;;  %v30_v23 = vlaneseq  ;;  %vm284_vm1 = vcmask 130048  }
  0x12   :  { %v363_v18 = vld [vmem:[%s497_s3 + $0x10] sm:$0xff]   ;;  %v365_v20 = vld [vmem:[%s497_s3 + $0x8] sm:$0xff]   ;;  %v366_v21 = vld [vmem:[%s497_s3 + $0x40] sm:$0xff]  }
  0x13   :  { %v367_v22 = vld [vmem:[%s497_s3] sm:$0xff]   ;;  %v31_v24 = vshrl.u32 %v30_v23, 7 }
  0x14   :  { %331 = vmatpush3.bf16.msra.mxu1 %v361_v16  ;;  %v28_v26 = vld [vmem:[%s496_s2] sm:$0x3]  ;;  %s391_s2 = smov [#allocation2]  }
  0x15   :  { %332 = vmatprep.subr.bf16.mxu1 %v362_v17  ;;  %v32_v25 = vsub.s32 0, %v31_v24  ;;  %v36_v27 = vsub.s32 1, %v31_v24  ;;  %v305_v41 = vld [vmem:[%s498_s4] ss:$0 sm:$0xff]  ;;  %s292_s0 = sshll.u32 %s391_s2, 4  ;;  %s293_s0 = int_to_ptr.vmem [resolvable:$true] %s292_s0 }
  0x16   :  { %s368_s10 = scalar_lea.vmem %s293_s0, 128  ;;  %p373_p1 = scmp.lt.s32.totalorder %s293_s0, %s293_s0 }
  0x17   :  { %v33_v28 = vrot.slane %v28_v26, %v32_v25  ;;  %v37_v29 = vrot.slane %v28_v26, %v36_v27  ;;  %p369_p0 = scmp.ne.s32.totalorder %s293_s0, %s368_s10  ;;  %p374_p2 = scmp.lt.s32.totalorder %s368_s10, %s368_s10 }
  0x18   :  { %333 = vmatpush3.bf16.msra.mxu1 %v363_v18 }
  0x19   :  { %334 = vmatprep.subr.bf16.mxu1 %v364_v19  ;;  %p375_p3 = por %p374_p2, %p373_p1 }
  0x1b   :  { %p376_p4 = pnand %p375_p3, %p369_p0 }
  0x1c   :  { %335 = vmatpush3.bf16.msra.mxu1 %v365_v20 }
  0x1d   :  { %336 = vmatprep.subr.bf16.mxu1 %v366_v21 }
  0x20   :  { %337 = vmatpush3.bf16.msra.mxu1 %v367_v22 }
  0xca   :  { %v98_v30 = vpop.f32.mrf.mxu0 }
  0xcb   :  { %v99_v31 = vadd.f32 %v98_v30, %v33_v28 }
  0xcc   :  { %v100_v32 = vpop.f32.mrf.mxu0 }
  0xcd   :  { %v101_v33 = vadd.f32 %v100_v32, %v37_v29  ;;  %v105_v34 = vmax.f32 %v99_v31, 0.0 }
  0xce   :  { %v102_v35 = vpop.f32.mrf.mxu0 }
  0xcf   :  { %v106_v36 = vmax.f32 %v101_v33, 0.0  ;;  %v107_v39 = vpack.c.bf16 %v105_v34, %v105_v34 }
  0xd0   :  { %v103_v37 = vpop.f32.mrf.mxu0 }
  0xd1   :  { %v108_v38 = vpack.c.bf16 %v106_v36, %v106_v36 }
  0xd3   :  { %276 = vmatprep.mubr.bf16.mxu1 %v108_v38 }
  0xd4   :  { %277 = vmatmul.mubr.bf16.vlgmr.msra.gmra.mxu1 %v107_v39 }
 0x194   :  { %v338_v40 = vpop.f32.mrf.mxu1 }
 0x196   :  { %v339_v42 = vpop.f32.mrf.mxu1 }
 0x197   :  { %v340_v43 = vadd.f32 %v339_v42, %v338_v40 }
 0x198   :  { %v341_v44 = vpop.f32.mrf.mxu1 }
 0x199   :  { %v279_v45 = vadd.f32 %v340_v43, %v305_v41 }
 0x19a   :  { %v342_v46 = vpop.f32.mrf.mxu1 }
 0x19b   :  { %285 = vst.msk [vmem:[#allocation2] sm:$0xff] %vm284_vm1, %v279_v45 }
 0x19c   :  { %379 = shalt.err (!%p376_p4)
}
 0x19d   :  { %295 = dma.vmem_to_hbm [thread:$0]  %s293_s0, 128, %s499_s5, [#allocation3]  }
 0x19e   :  { %388 = dma.done.wait [#allocation3], 128  }
 0x19f   :  { %389 = vsyncadd [#allocation3], 4294967168 }
 0x1a0   :  { %299 = vsyncpa [#allocation3], 1 }

</bundles_post_ra>
